<compile_context>
chip_gen: v7x
topology: tpu7x:2x2x1
jax: 0.10.0
libtpu: 0.0.40
codegen_flags: <defaults>
</compile_context>

<pallas_src>
import jax
import jax.numpy as jnp
from jax.experimental import pallas as pl
from jax.experimental.pallas import tpu as pltpu


def _round_up(a: int, b: int) -> int:
    return ((a + b - 1) // b) * b


def _make_kernel(fill):
    def kernel(x_ref, o_ref, acc_ref):
        # x_ref  : (row_block, l_block)  current input tile
        # o_ref  : (row_block, 1)        per-row global max (written on last L step)
        # acc_ref: (row_block, 128)      running elementwise max across L tiles
        l_step = pl.program_id(1)

        @pl.when(l_step == 0)
        def _init():
            acc_ref[...] = jnp.full_like(acc_ref, fill)

        # VPU-first: fold the L tile into the 128-lane accumulator with
        # elementwise maxes on static slices (VALU), keeping the XLU off the
        # critical path until the final reduce.
        n_slices = x_ref.shape[-1] // 128
        for j in range(n_slices):
            acc_ref[...] = jnp.maximum(
                acc_ref[...], x_ref[:, j * 128:(j + 1) * 128]
            )

        @pl.when(l_step == pl.num_programs(1) - 1)
        def _finalize():
            # Single cross-lane (XLU) reduce per output block.
            o_ref[...] = jnp.max(acc_ref[...], axis=-1, keepdims=True)

    return kernel


def _global_max_pool1d_pallas(x, *, row_block_target=512, l_block_target=2048):
    n, c, l = x.shape
    dtype = x.dtype
    itemsize = dtype.itemsize

    if jnp.issubdtype(dtype, jnp.floating):
        fill = float("-inf")
    elif jnp.issubdtype(dtype, jnp.integer):
        fill = int(jnp.iinfo(dtype).min)
    else:
        raise TypeError(f"unsupported dtype {dtype}")

    # Sublane packing: 8 rows (4B types), 16 (bf16/f16), 32 (int8/fp8).
    sublane = {4: 8, 2: 16, 1: 32}.get(itemsize, 8)

    rows = n * c
    row_block = min(row_block_target, _round_up(rows, sublane))
    l_block = min(l_block_target, _round_up(l, 128))

    grid_r = pl.cdiv(rows, row_block)
    grid_l = pl.cdiv(l, l_block)
    rows_pad = grid_r * row_block
    l_pad = grid_l * l_block

    x2d = x.reshape(rows, l)
    if (rows_pad, l_pad) != (rows, l):
        # Tail padding must never win the reduction.
        x2d = jnp.pad(
            x2d, ((0, rows_pad - rows), (0, l_pad - l)), constant_values=fill
        )

    out = pl.pallas_call(
        _make_kernel(fill),
        out_shape=jax.ShapeDtypeStruct((rows_pad, 1), dtype),
        grid=(grid_r, grid_l),
        in_specs=[pl.BlockSpec((row_block, l_block), lambda i, j: (i, j))],
        out_specs=pl.BlockSpec((row_block, 1), lambda i, j: (i, 0)),
        scratch_shapes=[pltpu.VMEM((row_block, 128), dtype)],
        compiler_params=pltpu.CompilerParams(
            dimension_semantics=("parallel", "arbitrary"),
        ),
        cost_estimate=pl.CostEstimate(
            flops=rows * l,
            transcendentals=0,
            bytes_accessed=rows * l * itemsize + rows * itemsize,
        ),
    )(x2d)

    return out[:rows].reshape(n, c, 1)


# Below a few hundred KiB the pallas_call fixed cost dwarfs the work; XLA's
# fused reduce is strictly faster there.
_PALLAS_MIN_BYTES = 256 * 1024


def global_max_pool1d(x, *, force_pallas=False, row_block=512, l_block=2048):
    """Equivalent of F.max_pool1d(x, kernel_size=x.shape[2]) for x of shape (N, C, L)."""
    if x.ndim != 3:
        raise ValueError(f"expected (N, C, L), got {x.shape}")
    if not force_pallas and x.size * x.dtype.itemsize < _PALLAS_MIN_BYTES:
        return jnp.max(x, axis=2, keepdims=True)
    return _global_max_pool1d_pallas(
        x, row_block_target=row_block, l_block_target=l_block
    )


if __name__ == "__main__":
    key = jax.random.PRNGKey(0)
    k1, k2, k3 = jax.random.split(key, 3)

    # 1) Small shape implied by the module (batch=2, channels=4, length=16),
    #    forced through the Pallas path so the kernel itself is exercised.
    N, C, L = 2, 4, 16
    x_small = jax.random.normal(k1, (N, C, L), dtype=jnp.float32)
    out_small = jax.block_until_ready(global_max_pool1d(x_small, force_pallas=True))
    ref_small = jnp.max(x_small, axis=2, keepdims=True)
    assert out_small.shape == (N, C, 1), out_small.shape
    assert jnp.array_equal(out_small, ref_small), "mismatch vs reference (small)"
    # Default dispatch (jnp fallback for tiny inputs) must agree too.
    assert jnp.array_equal(global_max_pool1d(x_small), ref_small)

    # 2) Unaligned shape: exercises row- and lane-axis padding with -inf.
    x_odd = jax.random.normal(k2, (3, 96, 200), dtype=jnp.float32)
    out_odd = jax.block_until_ready(global_max_pool1d(x_odd, force_pallas=True))
    assert jnp.array_equal(
        out_odd, jnp.max(x_odd, axis=2, keepdims=True)
    ), "mismatch vs reference (padded)"

    # 3) Larger bf16 input: auto-dispatches to Pallas with a multi-block grid
    #    (parallel row axis, L axis reduced via the resident accumulator).
    x_big = jax.random.normal(k3, (2, 512, 4096), dtype=jnp.bfloat16)
    out_big = jax.block_until_ready(global_max_pool1d(x_big))
    assert out_big.shape == (2, 512, 1), out_big.shape
    assert jnp.array_equal(
        out_big, jnp.max(x_big, axis=2, keepdims=True)
    ), "mismatch vs reference (bf16 tiled)"

    print("KERNEL_OK")
</pallas_src>

<mosaic_0001>
module attributes {stable_mosaic.version = 11 : i64} {
  func.func @kernel(%arg0: i32, %arg1: i32, %arg2: memref<8x128xf32, #tpu.memory_space<vmem>>, %arg3: memref<8x1xf32, #tpu.memory_space<vmem>>, %arg4: memref<8x128xf32, #tpu.memory_space<vmem>>) attributes {dimension_semantics = [#tpu.dimension_semantics<parallel>, #tpu.dimension_semantics<arbitrary>], iteration_bounds = array<i64: 1, 1>, scalar_prefetch = 0 : i64, scratch_operands = 1 : i64, tpu.core_type = #tpu.core_type<tc>, window_params = [{transform_indices = @transform_0, window_bounds = array<i64: 8, 128>}, {transform_indices = @transform_1, window_bounds = array<i64: 8, 1>}]} {
    %c0_i32 = arith.constant 0 : i32
    %0 = arith.cmpi eq, %arg1, %c0_i32 : i32
    %1 = arith.extui %0 : i1 to i32
    %c0_i32_0 = arith.constant 0 : i32
    %2 = arith.cmpi ne, %1, %c0_i32_0 : i32
    scf.if %2 {
      %cst = arith.constant 0xFF800000 : f32
      %10 = vector.broadcast %cst : f32 to vector<8x128xf32>
      %c0_8 = arith.constant 0 : index
      %c0_9 = arith.constant 0 : index
      %11 = vector.load %arg4[%c0_8, %c0_9] : memref<8x128xf32, #tpu.memory_space<vmem>>, vector<8x128xf32>
      tpu.vector_store %arg4[%c0_8, %c0_9], %10 {strides = array<i32>} : memref<8x128xf32, #tpu.memory_space<vmem>>, vector<8x128xf32>,
    } else {
    }
    %c0 = arith.constant 0 : index
    %c0_1 = arith.constant 0 : index
    %3 = vector.load %arg4[%c0, %c0_1] : memref<8x128xf32, #tpu.memory_space<vmem>>, vector<8x128xf32>
    %c0_2 = arith.constant 0 : index
    %c0_3 = arith.constant 0 : index
    %4 = vector.load %arg2[%c0_2, %c0_3] : memref<8x128xf32, #tpu.memory_space<vmem>>, vector<8x128xf32>
    %5 = arith.maximumf %3, %4 : vector<8x128xf32>
    %c0_4 = arith.constant 0 : index
    %c0_5 = arith.constant 0 : index
    %6 = vector.load %arg4[%c0_4, %c0_5] : memref<8x128xf32, #tpu.memory_space<vmem>>, vector<8x128xf32>
    tpu.vector_store %arg4[%c0_4, %c0_5], %5 {strides = array<i32>} : memref<8x128xf32, #tpu.memory_space<vmem>>, vector<8x128xf32>,
    %c0_i32_6 = arith.constant 0 : i32
    %7 = arith.cmpi eq, %arg1, %c0_i32_6 : i32
    %8 = arith.extui %7 : i1 to i32
    %c0_i32_7 = arith.constant 0 : i32
    %9 = arith.cmpi ne, %8, %c0_i32_7 : i32
    scf.if %9 {
      %c0_8 = arith.constant 0 : index
      %c0_9 = arith.constant 0 : index
      %10 = vector.load %arg4[%c0_8, %c0_9] : memref<8x128xf32, #tpu.memory_space<vmem>>, vector<8x128xf32>
      %cst = arith.constant dense<0xFF800000> : vector<8xf32>
      %11 = vector.multi_reduction <maximumf>, %10, %cst [1] : vector<8x128xf32> to vector<8xf32>
      %12 = vector.shape_cast %11 : vector<8xf32> to vector<8x1xf32>
      %c0_10 = arith.constant 0 : index
      %c0_11 = arith.constant 0 : index
      %13 = vector.load %arg3[%c0_10, %c0_11] : memref<8x1xf32, #tpu.memory_space<vmem>>, vector<8x1xf32>
      tpu.vector_store %arg3[%c0_10, %c0_11], %12 {strides = array<i32>} : memref<8x1xf32, #tpu.memory_space<vmem>>, vector<8x1xf32>,
    } else {
    }
    return
  }
  func.func @transform_0(%arg0: i32, %arg1: i32) -> (i32, i32) {
    %c0_i32 = arith.constant 0 : i32
    return %arg0, %arg1 : i32, i32
  }
  func.func @transform_1(%arg0: i32, %arg1: i32) -> (i32, i32) {
    %c0_i32 = arith.constant 0 : i32
    %c0_i32_0 = arith.constant 0 : i32
    return %arg0, %c0_i32 : i32, i32
  }
}

</mosaic_0001>

<bundles_post_ra>
// kernel: tpu_custom_call.1
= control target key start
LH: loop header
LB: loop body
LE: loop exit
PB: predicated region body
PF: predicated region fallthrough
CT: control target
= control target key end

     0   :  { %6 = vsyncpa [#allocation4], 0  ;;  %s67_s6 = smov [#allocation3]   ;;  %s93_s0 = inlined_call_operand.hbm [shape: f32[8,128], index: 0, kind: input, shape index: {}]   ;;  %s94_s1 = inlined_call_operand.vmem [shape: f32[8,1], index: 1, kind: output, shape index: {}]  }
   0x1   :  { %s13_s7 = sshll.u32 %s67_s6, 4  ;;  %s43_s10 = scalar_lea.hbm %s93_s0, 128  ;;  %s14_s7 = int_to_ptr.vmem [resolvable:$true] %s13_s7 }
   0x2   :  { %p44_p0 = scmp.ne.s32.totalorder %s93_s0, %s43_s10  ;;  %p47_p1 = scmp.lt.u32.totalorder %s43_s10, %s93_s0 }
   0x4   :  { %p49_p2 = pnand %p47_p1, %p44_p0 }
   0x6   :  { %52 = shalt.err (!%p49_p2)
}
   0x7   :  { %s53_s15 = scalar_lea.vmem %s14_s7, 128  ;;  %p58_p4 = scmp.lt.s32.totalorder %s14_s7, %s14_s7 }
   0x8   :  { %p54_p3 = scmp.ne.s32.totalorder %s14_s7, %s53_s15  ;;  %p59_p5 = scmp.lt.s32.totalorder %s53_s15, %s53_s15 }
   0xa   :  { %p60_p6 = por %p59_p5, %p58_p4 }
   0xc   :  { %p61_p7 = pnand %p60_p6, %p54_p3 }
   0xe   :  { %64 = shalt.err (!%p61_p7)
}
   0xf   :  { %16 = dma.hbm_to_vmem [thread:$0]  %s93_s0, 128, %s14_s7, [#allocation4]  }
  0x10   :  { %65 = dma.done.wait [#allocation4], 128  }
  0x11   :  { %66 = vsyncadd [#allocation4], 4294967168  ;;  %v26_v0 = vld [vmem:[#allocation3] sm:$0xff]  ;;  %vm35_vm0 = vcmask 7168  }
  0x12   :  { %33 = vmax.xlane.f32.xlu0 %v26_v0 }
  0x9f   :  { %v34_v1 = vpop.xlane.xlu0 %33 }
  0xa0   :  { %36 = vst.msk [vmem:[%s94_s1] sm:$0xff] %vm35_vm0, %v34_v1 }
  0xa1   :  { %41 = vsyncpa [#allocation4], 1 }

</bundles_post_ra>
